<compile_context>
chip_gen: v7x
topology: tpu7x:2x2x1
jax: 0.10.0
libtpu: 0.0.40
codegen_flags: <defaults>
</compile_context>

<pallas_src>
import jax
import jax.numpy as jnp
from jax.experimental import pallas as pl
from jax.experimental.pallas import tpu as pltpu


def _round_up(x, m):
    return ((x + m - 1) // m) * m


# ----------------------------------------------------------------------------
# Fused kernel (all layers + per-row MSE for one batch tile)
# ----------------------------------------------------------------------------
def _make_fused_kernel(acts, compute_decoded):
    """Ref order: x_ref, w0, b0, w1, b1, ..., [decoded_ref,] err_ref."""
    n_layers = len(acts)

    def kernel(*refs):
        x_ref = refs[0]
        wb = refs[1:1 + 2 * n_layers]
        if compute_decoded:
            decoded_ref = refs[1 + 2 * n_layers]
            err_ref = refs[2 + 2 * n_layers]
        else:
            err_ref = refs[1 + 2 * n_layers]

        x_nat = x_ref[...]
        h = x_nat
        for li, act in enumerate(acts):
            w = wb[2 * li][...]
            b = wb[2 * li + 1][...]
            # Feed the MXU native-dtype operands (bf16 params -> bf16 matmul),
            # accumulate in f32; keep activation math in f32.
            if h.dtype != w.dtype:
                h = h.astype(w.dtype)
            h = jnp.dot(h, w, preferred_element_type=jnp.float32)
            h = h + b.astype(jnp.float32)
            if act == "relu":
                h = jnp.maximum(h, 0.0)
            elif act == "sigmoid":
                h = jax.nn.sigmoid(h)
            elif act != "none":
                raise ValueError(f"unknown act {act}")

        if compute_decoded:
            decoded_ref[...] = h.astype(decoded_ref.dtype)

        # Per-row MSE, produced lane-dense as a (1, tb) row:
        #   sumsq[0, t] = sum_d diff[t, d]^2  ==  ones(1, D) @ diff_sq^T
        diff = x_nat.astype(jnp.float32) - h
        dsq = diff * diff
        d = dsq.shape[1]
        ones_row = jnp.ones((1, d), jnp.float32)
        sumsq = jax.lax.dot_general(
            ones_row, dsq,
            dimension_numbers=(((1,), (1,)), ((), ())),
            preferred_element_type=jnp.float32,
        )  # (1, tb), batch mapped to lanes
        err_ref[...] = (sumsq * (1.0 / d)).reshape(err_ref.shape).astype(
            err_ref.dtype
        )

    return kernel


# ----------------------------------------------------------------------------
# Host wrapper
# ----------------------------------------------------------------------------
def autoencoder_forward_and_error(
    x,
    layers,
    *,
    max_batch_tile=1024,
    compute_decoded=True,
    vmem_tile_budget_bytes=24 * 1024 * 1024,
):
    """Fused encoder+decoder forward and per-row MSE in a single pallas_call.

    Returns (decoded, err) where decoded.shape == x.shape (or None when
    compute_decoded=False) and err.shape == (batch,).
    """
    batch, input_dim = x.shape
    out_dtype = x.dtype

    # Pad only to the sublane multiple (<= 7 dead rows), never to a full tile;
    # ragged last tiles are handled by Pallas boundary-block masking.
    padded = _round_up(batch, 8)
    if padded != batch:
        x = jnp.pad(x, ((0, padded - batch), (0, 0)))

    # ---- batch-tile selection ------------------------------------------
    tb = min(max_batch_tile, padded)
    if padded > 8:
        # Guarantee >= 2 grid steps so both v7x TensorCores get work.
        tb = min(tb, _round_up(pl.cdiv(padded, 2), 8))
    tb = max(8, (tb // 8) * 8)

    def _tile_bytes(t):
        b = 2 * t * input_dim * x.dtype.itemsize            # x, double-buffered
        if compute_decoded:
            b += 2 * t * input_dim * out_dtype.itemsize     # decoded
        b += 2 * t * 4                                       # err row
        return b

    while tb > 8 and _tile_bytes(tb) > vmem_tile_budget_bytes:
        tb = max(8, ((tb // 2) // 8) * 8)

    num_tiles = pl.cdiv(padded, tb)

    acts = tuple(act for (_, _, act) in layers)
    kernel = _make_fused_kernel(acts, compute_decoded)

    # Inputs: x (batch-tiled) + every W/b kept VMEM-resident (constant maps).
    in_specs = [pl.BlockSpec((tb, input_dim), lambda i: (i, 0))]
    flat_inputs = [x]
    for w, b, _ in layers:
        in_specs.append(pl.BlockSpec(w.shape, lambda i: (0, 0)))
        in_specs.append(pl.BlockSpec(b.shape, lambda i: (0, 0)))
        flat_inputs.append(w)
        flat_inputs.append(b)

    # Lane-dense per-tile error row: (num_tiles, 1, tb), block (1, 1, tb).
    err_shape = jax.ShapeDtypeStruct((num_tiles, 1, tb), jnp.float32)
    err_spec = pl.BlockSpec((1, 1, tb), lambda i: (i, 0, 0))
    if compute_decoded:
        out_shape = (jax.ShapeDtypeStruct((padded, input_dim), out_dtype),
                     err_shape)
        out_specs = (pl.BlockSpec((tb, input_dim), lambda i: (i, 0)), err_spec)
    else:
        out_shape = err_shape
        out_specs = err_spec

    # VMEM limit: above v5e's 16 MiB default, below v7x's 64 MiB physical.
    weight_bytes = sum(
        w.size * w.dtype.itemsize + b.size * b.dtype.itemsize
        for w, b, _ in layers
    )
    vmem_limit = int(
        min(max(32 * 2**20, 2 * (_tile_bytes(tb) + 2 * weight_bytes)
                + 4 * 2**20),
            48 * 2**20)
    )

    # Advisory cost estimate.
    flops = 3 * padded * input_dim  # residual + square + mean
    bytes_accessed = x.size * x.dtype.itemsize + weight_bytes
    for w, b, _ in layers:
        flops += 2 * padded * w.shape[0] * w.shape[1]
    if compute_decoded:
        bytes_accessed += padded * input_dim * out_dtype.itemsize
    bytes_accessed += num_tiles * tb * 4
    transcendentals = 2 * padded * input_dim  # final sigmoid (exp + recip)

    result = pl.pallas_call(
        kernel,
        out_shape=out_shape,
        grid=(num_tiles,),
        in_specs=in_specs,
        out_specs=out_specs,
        compiler_params=pltpu.CompilerParams(
            dimension_semantics=("parallel",),
            vmem_limit_bytes=vmem_limit,
        ),
        cost_estimate=pl.CostEstimate(
            flops=flops,
            transcendentals=transcendentals,
            bytes_accessed=bytes_accessed,
        ),
    )(*flat_inputs)

    if compute_decoded:
        decoded, err3 = result
        decoded = decoded[:batch]
    else:
        decoded, err3 = None, result

    err = err3.reshape(-1)[:batch]
    return decoded, err


def autoencoder_forward(x, layers):
    """encoded = encoder(x); decoded = decoder(encoded); return decoded."""
    decoded, _ = autoencoder_forward_and_error(x, layers, compute_decoded=True)
    return decoded


def reconstruction_error(x, layers):
    """get_reconstruction_error: mean((x - recon)**2, dim=1). Err-only path —
    skips the discarded decoded HBM write entirely."""
    _, err = autoencoder_forward_and_error(x, layers, compute_decoded=False)
    return err


# ----------------------------------------------------------------------------
# Parameter init (mimics PyTorch nn.Linear default U(-k, k), k = 1/sqrt(fan_in))
# ----------------------------------------------------------------------------
def init_autoencoder_params(key, input_dim, hidden_dims, dtype=jnp.float32):
    """Returns a list of (W, b, act) triples for the full encoder+decoder stack.
    W is stored (in_features, out_features) so the kernel computes y = x@W + b.
    Dropout(0.2) layers are inference-mode identity."""
    layers = []

    def make_layer(key, fan_in, fan_out):
        kw, kb = jax.random.split(key)
        bound = 1.0 / jnp.sqrt(fan_in)
        w = jax.random.uniform(kw, (fan_in, fan_out), dtype, -bound, bound)
        b = jax.random.uniform(kb, (1, fan_out), dtype, -bound, bound)
        return w, b

    prev_dim = input_dim
    for hd in hidden_dims:
        key, sub = jax.random.split(key)
        w, b = make_layer(sub, prev_dim, hd)
        layers.append((w, b, "relu"))
        prev_dim = hd

    for i in range(len(hidden_dims) - 1, -1, -1):
        key, sub = jax.random.split(key)
        if i == 0:
            w, b = make_layer(sub, prev_dim, input_dim)
            layers.append((w, b, "sigmoid"))
        else:
            w, b = make_layer(sub, prev_dim, hidden_dims[i - 1])
            layers.append((w, b, "relu"))
            prev_dim = hidden_dims[i - 1]

    return layers


# ----------------------------------------------------------------------------
# Pure-JAX reference (correctness checking only)
# ----------------------------------------------------------------------------
def _ref_forward(x, layers):
    h = x
    for w, b, act in layers:
        h = h @ w + b
        if act == "relu":
            h = jnp.maximum(h, 0.0)
        elif act == "sigmoid":
            h = jax.nn.sigmoid(h)
    return h


if __name__ == "__main__":
    key = jax.random.PRNGKey(0)
    k_data, k_params = jax.random.split(key)

    batch = 16
    input_dim = 32
    hidden_dims = [16, 8]

    x = jax.random.uniform(k_data, (batch, input_dim), jnp.float32)
    layers = init_autoencoder_params(k_params, input_dim, hidden_dims)

    # Forward path (decoded + err) and err-only scoring path.
    decoded, err = autoencoder_forward_and_error(x, layers)
    err_only = reconstruction_error(x, layers)
    jax.block_until_ready(decoded)
    jax.block_until_ready(err)
    jax.block_until_ready(err_only)

    assert decoded.shape == (batch, input_dim)
    assert err.shape == (batch,)
    assert err_only.shape == (batch,)
    # Sigmoid output must lie in [0, 1] (f32 sigmoid can saturate to exactly 1).
    assert bool(jnp.all((decoded >= 0.0) & (decoded <= 1.0)))

    # Correctness vs. pure-JAX reference (loose tol: MXU f32 path may
    # internally run as multi-pass bf16).
    ref_decoded = _ref_forward(x, layers)
    ref_err = jnp.mean((x - ref_decoded) ** 2, axis=1)
    assert bool(jnp.allclose(decoded, ref_decoded, rtol=2e-2, atol=2e-2))
    assert bool(jnp.allclose(err, ref_err, rtol=2e-2, atol=2e-2))
    assert bool(jnp.allclose(err_only, ref_err, rtol=2e-2, atol=2e-2))

    print("KERNEL_OK")
</pallas_src>

<mosaic_0001>
module attributes {stable_mosaic.version = 11 : i64} {
  func.func @kernel(%arg0: i32, %arg1: memref<8x32xf32, #tpu.memory_space<vmem>>, %arg2: memref<32x16xf32, #tpu.memory_space<vmem>>, %arg3: memref<1x16xf32, #tpu.memory_space<vmem>>, %arg4: memref<16x8xf32, #tpu.memory_space<vmem>>, %arg5: memref<1x8xf32, #tpu.memory_space<vmem>>, %arg6: memref<8x16xf32, #tpu.memory_space<vmem>>, %arg7: memref<1x16xf32, #tpu.memory_space<vmem>>, %arg8: memref<16x32xf32, #tpu.memory_space<vmem>>, %arg9: memref<1x32xf32, #tpu.memory_space<vmem>>, %arg10: memref<8x32xf32, #tpu.memory_space<vmem>>, %arg11: memref<1x1x8xf32, #tpu.memory_space<vmem>>) attributes {dimension_semantics = [#tpu.dimension_semantics<parallel>], iteration_bounds = array<i64: 2>, scalar_prefetch = 0 : i64, scratch_operands = 0 : i64, tpu.core_type = #tpu.core_type<tc>, window_params = [{transform_indices = @transform_0, window_bounds = array<i64: 8, 32>}, {pipeline_mode = #tpu.pipeline_mode<synchronous>, transform_indices = @transform_1, window_bounds = array<i64: 32, 16>}, {pipeline_mode = #tpu.pipeline_mode<synchronous>, transform_indices = @transform_2, window_bounds = array<i64: 1, 16>}, {pipeline_mode = #tpu.pipeline_mode<synchronous>, transform_indices = @transform_3, window_bounds = array<i64: 16, 8>}, {pipeline_mode = #tpu.pipeline_mode<synchronous>, transform_indices = @transform_4, window_bounds = array<i64: 1, 8>}, {pipeline_mode = #tpu.pipeline_mode<synchronous>, transform_indices = @transform_5, window_bounds = array<i64: 8, 16>}, {pipeline_mode = #tpu.pipeline_mode<synchronous>, transform_indices = @transform_6, window_bounds = array<i64: 1, 16>}, {pipeline_mode = #tpu.pipeline_mode<synchronous>, transform_indices = @transform_7, window_bounds = array<i64: 16, 32>}, {pipeline_mode = #tpu.pipeline_mode<synchronous>, transform_indices = @transform_8, window_bounds = array<i64: 1, 32>}, {transform_indices = @transform_9, window_bounds = array<i64: 8, 32>}, {transform_indices = @transform_10, window_bounds = array<i64: 1, 1, 8>}]} {
    %c0 = arith.constant 0 : index
    %c0_0 = arith.constant 0 : index
    %0 = vector.load %arg1[%c0, %c0_0] : memref<8x32xf32, #tpu.memory_space<vmem>>, vector<8x32xf32>
    %c0_1 = arith.constant 0 : index
    %c0_2 = arith.constant 0 : index
    %1 = vector.load %arg2[%c0_1, %c0_2] : memref<32x16xf32, #tpu.memory_space<vmem>>, vector<32x16xf32>
    %c0_3 = arith.constant 0 : index
    %c0_4 = arith.constant 0 : index
    %2 = vector.load %arg3[%c0_3, %c0_4] : memref<1x16xf32, #tpu.memory_space<vmem>>, vector<1x16xf32>
    %cst = arith.constant dense<0.000000e+00> : vector<8x16xf32>
    %3 = tpu.matmul %0, %1, %cst {dimension_numbers = #tpu.dot_dimension_numbers<[1], [0], [0], [1], [0, 0, 1, 1], [], []>} : vector<8x32xf32>, vector<32x16xf32>, vector<8x16xf32> -> vector<8x16xf32>
    %4 = vector.broadcast %2 : vector<1x16xf32> to vector<8x16xf32>
    %5 = arith.addf %3, %4 : vector<8x16xf32>
    %cst_5 = arith.constant 0.000000e+00 : f32
    %6 = vector.broadcast %cst_5 : f32 to vector<8x16xf32>
    %7 = arith.maximumf %5, %6 : vector<8x16xf32>
    %c0_6 = arith.constant 0 : index
    %c0_7 = arith.constant 0 : index
    %8 = vector.load %arg4[%c0_6, %c0_7] : memref<16x8xf32, #tpu.memory_space<vmem>>, vector<16x8xf32>
    %c0_8 = arith.constant 0 : index
    %c0_9 = arith.constant 0 : index
    %9 = vector.load %arg5[%c0_8, %c0_9] : memref<1x8xf32, #tpu.memory_space<vmem>>, vector<1x8xf32>
    %cst_10 = arith.constant dense<0.000000e+00> : vector<8x8xf32>
    %10 = tpu.matmul %7, %8, %cst_10 {dimension_numbers = #tpu.dot_dimension_numbers<[1], [0], [0], [1], [0, 0, 1, 1], [], []>} : vector<8x16xf32>, vector<16x8xf32>, vector<8x8xf32> -> vector<8x8xf32>
    %11 = vector.broadcast %9 : vector<1x8xf32> to vector<8x8xf32>
    %12 = arith.addf %10, %11 : vector<8x8xf32>
    %cst_11 = arith.constant 0.000000e+00 : f32
    %13 = vector.broadcast %cst_11 : f32 to vector<8x8xf32>
    %14 = arith.maximumf %12, %13 : vector<8x8xf32>
    %c0_12 = arith.constant 0 : index
    %c0_13 = arith.constant 0 : index
    %15 = vector.load %arg6[%c0_12, %c0_13] : memref<8x16xf32, #tpu.memory_space<vmem>>, vector<8x16xf32>
    %c0_14 = arith.constant 0 : index
    %c0_15 = arith.constant 0 : index
    %16 = vector.load %arg7[%c0_14, %c0_15] : memref<1x16xf32, #tpu.memory_space<vmem>>, vector<1x16xf32>
    %cst_16 = arith.constant dense<0.000000e+00> : vector<8x16xf32>
    %17 = tpu.matmul %14, %15, %cst_16 {dimension_numbers = #tpu.dot_dimension_numbers<[1], [0], [0], [1], [0, 0, 1, 1], [], []>} : vector<8x8xf32>, vector<8x16xf32>, vector<8x16xf32> -> vector<8x16xf32>
    %18 = vector.broadcast %16 : vector<1x16xf32> to vector<8x16xf32>
    %19 = arith.addf %17, %18 : vector<8x16xf32>
    %cst_17 = arith.constant 0.000000e+00 : f32
    %20 = vector.broadcast %cst_17 : f32 to vector<8x16xf32>
    %21 = arith.maximumf %19, %20 : vector<8x16xf32>
    %c0_18 = arith.constant 0 : index
    %c0_19 = arith.constant 0 : index
    %22 = vector.load %arg8[%c0_18, %c0_19] : memref<16x32xf32, #tpu.memory_space<vmem>>, vector<16x32xf32>
    %c0_20 = arith.constant 0 : index
    %c0_21 = arith.constant 0 : index
    %23 = vector.load %arg9[%c0_20, %c0_21] : memref<1x32xf32, #tpu.memory_space<vmem>>, vector<1x32xf32>
    %cst_22 = arith.constant dense<0.000000e+00> : vector<8x32xf32>
    %24 = tpu.matmul %21, %22, %cst_22 {dimension_numbers = #tpu.dot_dimension_numbers<[1], [0], [0], [1], [0, 0, 1, 1], [], []>} : vector<8x16xf32>, vector<16x32xf32>, vector<8x32xf32> -> vector<8x32xf32>
    %25 = vector.broadcast %23 : vector<1x32xf32> to vector<8x32xf32>
    %26 = arith.addf %24, %25 : vector<8x32xf32>
    %27 = arith.negf %26 : vector<8x32xf32>
    %28 = math.exp %27 : vector<8x32xf32>
    %cst_23 = arith.constant 1.000000e+00 : f32
    %29 = vector.broadcast %cst_23 : f32 to vector<8x32xf32>
    %30 = arith.addf %29, %28 : vector<8x32xf32>
    %31 = arith.divf %29, %30 : vector<8x32xf32>
    %c0_24 = arith.constant 0 : index
    %c0_25 = arith.constant 0 : index
    %32 = vector.load %arg10[%c0_24, %c0_25] : memref<8x32xf32, #tpu.memory_space<vmem>>, vector<8x32xf32>
    tpu.vector_store %arg10[%c0_24, %c0_25], %31 {strides = array<i32>} : memref<8x32xf32, #tpu.memory_space<vmem>>, vector<8x32xf32>,
    %33 = arith.subf %0, %31 : vector<8x32xf32>
    %34 = arith.mulf %33, %33 : vector<8x32xf32>
    %cst_26 = arith.constant 1.000000e+00 : f32
    %35 = vector.broadcast %cst_26 : f32 to vector<1x32xf32>
    %cst_27 = arith.constant dense<0.000000e+00> : vector<1x8xf32>
    %36 = tpu.matmul %35, %34, %cst_27 {dimension_numbers = #tpu.dot_dimension_numbers<[1], [1], [0], [0], [0, 0, 1, 0], [], []>} : vector<1x32xf32>, vector<8x32xf32>, vector<1x8xf32> -> vector<1x8xf32>
    %cst_28 = arith.constant 3.125000e-02 : f32
    %37 = vector.broadcast %cst_28 : f32 to vector<1x8xf32>
    %38 = arith.mulf %36, %37 : vector<1x8xf32>
    %39 = vector.shape_cast %38 : vector<1x8xf32> to vector<1x1x8xf32>
    %c0_29 = arith.constant 0 : index
    %c0_30 = arith.constant 0 : index
    %c0_31 = arith.constant 0 : index
    %40 = vector.load %arg11[%c0_29, %c0_30, %c0_31] : memref<1x1x8xf32, #tpu.memory_space<vmem>>, vector<1x1x8xf32>
    tpu.vector_store %arg11[%c0_29, %c0_30, %c0_31], %39 {strides = array<i32>} : memref<1x1x8xf32, #tpu.memory_space<vmem>>, vector<1x1x8xf32>,
    return
  }
  func.func @transform_0(%arg0: i32) -> (i32, i32) {
    %c0_i32 = arith.constant 0 : i32
    %c0_i32_0 = arith.constant 0 : i32
    return %arg0, %c0_i32 : i32, i32
  }
  func.func @transform_1(%arg0: i32) -> (i32, i32) {
    %c0_i32 = arith.constant 0 : i32
    %c0_i32_0 = arith.constant 0 : i32
    %c0_i32_1 = arith.constant 0 : i32
    return %c0_i32, %c0_i32_0 : i32, i32
  }
  func.func @transform_2(%arg0: i32) -> (i32, i32) {
    %c0_i32 = arith.constant 0 : i32
    %c0_i32_0 = arith.constant 0 : i32
    %c0_i32_1 = arith.constant 0 : i32
    return %c0_i32, %c0_i32_0 : i32, i32
  }
  func.func @transform_3(%arg0: i32) -> (i32, i32) {
    %c0_i32 = arith.constant 0 : i32
    %c0_i32_0 = arith.constant 0 : i32
    %c0_i32_1 = arith.constant 0 : i32
    return %c0_i32, %c0_i32_0 : i32, i32
  }
  func.func @transform_4(%arg0: i32) -> (i32, i32) {
    %c0_i32 = arith.constant 0 : i32
    %c0_i32_0 = arith.constant 0 : i32
    %c0_i32_1 = arith.constant 0 : i32
    return %c0_i32, %c0_i32_0 : i32, i32
  }
  func.func @transform_5(%arg0: i32) -> (i32, i32) {
    %c0_i32 = arith.constant 0 : i32
    %c0_i32_0 = arith.constant 0 : i32
    %c0_i32_1 = arith.constant 0 : i32
    return %c0_i32, %c0_i32_0 : i32, i32
  }
  func.func @transform_6(%arg0: i32) -> (i32, i32) {
    %c0_i32 = arith.constant 0 : i32
    %c0_i32_0 = arith.constant 0 : i32
    %c0_i32_1 = arith.constant 0 : i32
    return %c0_i32, %c0_i32_0 : i32, i32
  }
  func.func @transform_7(%arg0: i32) -> (i32, i32) {
    %c0_i32 = arith.constant 0 : i32
    %c0_i32_0 = arith.constant 0 : i32
    %c0_i32_1 = arith.constant 0 : i32
    return %c0_i32, %c0_i32_0 : i32, i32
  }
  func.func @transform_8(%arg0: i32) -> (i32, i32) {
    %c0_i32 = arith.constant 0 : i32
    %c0_i32_0 = arith.constant 0 : i32
    %c0_i32_1 = arith.constant 0 : i32
    return %c0_i32, %c0_i32_0 : i32, i32
  }
  func.func @transform_9(%arg0: i32) -> (i32, i32) {
    %c0_i32 = arith.constant 0 : i32
    %c0_i32_0 = arith.constant 0 : i32
    return %arg0, %c0_i32 : i32, i32
  }
  func.func @transform_10(%arg0: i32) -> (i32, i32, i32) {
    %c0_i32 = arith.constant 0 : i32
    %c0_i32_0 = arith.constant 0 : i32
    %c0_i32_1 = arith.constant 0 : i32
    return %arg0, %c0_i32, %c0_i32_0 : i32, i32, i32
  }
}

</mosaic_0001>

<bundles_post_ra>
// kernel: tpu_custom_call.1
= control target key start
LH: loop header
LB: loop body
LE: loop exit
PB: predicated region body
PF: predicated region fallthrough
CT: control target
= control target key end

     0   :  { %s1379_s0 = inlined_call_operand.vmem [shape: f32[16,32], index: 0, kind: input, shape index: {}]   ;;  %s1380_s1 = inlined_call_operand.vmem [shape: f32[32,16], index: 1, kind: input, shape index: {}]   ;;  %s1381_s2 = inlined_call_operand.vmem [shape: f32[1,16], index: 2, kind: input, shape index: {}]   ;;  %s1382_s3 = inlined_call_operand.vmem [shape: f32[16,8], index: 3, kind: input, shape index: {}]   ;;  %s1383_s4 = inlined_call_operand.vmem [shape: f32[1,8], index: 4, kind: input, shape index: {}]   ;;  %s1384_s5 = inlined_call_operand.vmem [shape: f32[8,16], index: 5, kind: input, shape index: {}]   ;;  %s1385_s6 = inlined_call_operand.vmem [shape: f32[1,16], index: 6, kind: input, shape index: {}]   ;;  %s1386_s7 = inlined_call_operand.vmem [shape: f32[16,32], index: 7, kind: input, shape index: {}]   ;;  %s1387_s8 = inlined_call_operand.vmem [shape: f32[1,32], index: 8, kind: input, shape index: {}]   ;;  %s1388_s9 = inlined_call_operand.hbm [shape: f32[16,32], index: 9, kind: output, shape index: {0}]   ;;  %s1389_s10 = inlined_call_operand.hbm [shape: f32[2,1,8], index: 10, kind: output, shape index: {1}]  }
   0x1   :  { %1390 = sst [smem:[#allocation8_spill]] %s1379_s0 }
   0x2   :  { %16 = vsyncpa [#allocation3], 0 }
   0x3   :  { %18 = vsyncpa [#allocation3 + $0x1], 0 }
   0x4   :  { %19 = vsyncpa [#allocation5], 0 }
   0x5   :  { %21 = vsyncpa [#allocation5 + $0x1], 0  ;;  %s1200_s13 = smov 0   ;;  %s1202_s14 = smov 0  }
   0x6   :  { %s1204_s15 = smov 0   ;;  %s1206_s16 = smov 0  }
   0x7 LB: > { %s1221_s17 = sadd.s32 4294967295, %s1137_s16   ;;  %s907_s18 = sadd.s32 4294967294, %s1137_s16   ;;  %s1137_s16 = sphi %s1206_s16, %s1397_s16   ;;  %s1133_s15 = sphi %s1204_s15, %s1396_s15   ;;  %s1129_s14 = sphi %s1202_s14, %s1395_s14   ;;  %s1125_s13 = sphi %s1200_s13, %s1394_s13  }
   0x8   : > { %s1225_s19 = sadd.s32 1, %s1137_s16   ;;  %s228_s20 = sadd.s32 1, %s1133_s15 }
   0x9   : > { %s225_s21 = ssub.s32 %s1137_s16, %s1225_s19  ;;  %p238_p0 = scmp.ne.s32.totalorder %s1133_s15, %s1129_s14 }
   0xa   : > { %p226_p1 = scmp.eq.s32.totalorder %s225_s21, 0  ;;  %p239_p2 = scmp.eq.s32.totalorder %s1221_s17, 1 }
   0xb   : > { %p244_p3 = scmp.ne.s32.totalorder %s1129_s14, %s1125_s13  ;;  %p245_p4 = scmp.eq.s32.totalorder %s907_s18, 1 }
   0xc   : > { %s1236_s22 = scalar_select %p226_p1, %s1133_s15, %s228_s20  }
   0xd   : > { %p1238_p5 = por %p239_p2, %p238_p0  ;;  %p1242_p6 = por %p245_p4, %p244_p3 }
   0xe   : > { %p910_p7 = scmp.ge.s32.totalorder %s1137_s16, 1  ;;  %p320_p8 = scmp.lt.s32.totalorder %s1137_s16, 3 }
  0x10   : > { %p321_p9 = pnand %p910_p7, %p320_p8 }
  0x11   : > { %v366_v0 = vld [vmem:[%s1380_s1] sm:$0xff] (!%p321_p9)  ;;  %v367_v1 = vld [vmem:[%s1380_s1 + $0x8] sm:$0xff] (!%p321_p9)  ;;  %v368_v2 = vld [vmem:[%s1380_s1 + $0x10] sm:$0xff] (!%p321_p9)  ;;  %v1139_v3 = vmov (!%p321_p9), 0.0|0.0   ;;  %vm1140_vm0 = vmmov (!%p321_p9), 0   ;;  %v1141_v6 = vmov (!%p321_p9), 0.0  }
  0x12   : > { %324 = sbr.rel (%p321_p9) target bundleno = 1153 (0x481), region = 56  ;;  %979 = vmatprep.subr.bf16.mxu0 (!%p321_p9), %v1139_v3  ;;  %v980_v4 = vpack.c.bf16 (!%p321_p9), %v367_v1, %v366_v0  ;;  %v369_v5 = vld [vmem:[%s1380_s1 + $0x18] sm:$0xff] (!%p321_p9)  ;;  %952 = vmatprep.mubr.msk.f32.mxu0 (!%p321_p9), %vm1140_vm0, %v1141_v6  ;;  %p361_p10 = scmp.lt.s32.totalorder (!%p321_p9), %s1221_s17, 1  ;;  %vm377_vm1 = vcmask (!%p321_p9), 261120   ;;  %v452_v9 = vld [vmem:[%s1382_s3] sm:$0xff] (!%p321_p9)  ;;  %v453_v10 = vld [vmem:[%s1382_s3 + $0x8] sm:$0xff] (!%p321_p9) }
  0x13   : > { %985 = vmatprep.subr.bf16.mxu1 (!%p321_p9), %v1139_v3  ;;  %959 = vmatprep.mubr.msk.f32.mxu1 (!%p321_p9), %vm1140_vm0, %v1141_v6  ;;  %v983_v7 = vpack.c.bf16 (!%p321_p9), %v369_v5, %v368_v2  ;;  %s1393_s0 = sld [smem:[#allocation8_spill]] (!%p321_p9)  ;;  %v986_v11 = vpack.c.bf16 (!%p321_p9), %v453_v10, %v452_v9  ;;  %v913_v12 = vld [vmem:[%s1381_s2] ss:$0 sm:$0xff] (!%p321_p9)  ;;  %vm461_vm2 = vcmask (!%p321_p9), 130048   ;;  %vm544_vm3 = vcmask (!%p321_p9), 64512   ;;  %v620_v24 = vld [vmem:[%s1386_s7 + $0x8] sm:$0xff] (!%p321_p9) }
  0x14   : > { %981 = vmatpush3.bf16.msra.mxu0 (!%p321_p9), %v980_v4  ;;  %v536_v17 = vld [vmem:[%s1384_s5] sm:$0xff] (!%p321_p9)  ;;  %v1142_v41 = vmov (!%p321_p9), 1.0  }
  0x15   : > { %982 = vmatprep.subr.bf16.mxu0 (!%p321_p9), %v1139_v3  ;;  %987 = vmatpush3.bf16.msra.mxu1 (!%p321_p9), %v986_v11  ;;  %v915_v18 = vld [vmem:[%s1383_s4] ss:$0 sm:$0xff] (!%p321_p9) }
  0x16   : > { %962 = vmatprep.subr.mxu1 (!%p321_p9), %v1141_v6  ;;  %v619_v23 = vld [vmem:[%s1386_s7] sm:$0xff] (!%p321_p9) }
  0x17   : > { %v989_v25 = vpack.c.bf16 (!%p321_p9), %v620_v24, %v619_v23  ;;  %v917_v26 = vld [vmem:[%s1385_s6] ss:$0 sm:$0xff] (!%p321_p9) }
  0x18   : > { %984 = vmatpush3.bf16.msra.mxu0 (!%p321_p9), %v983_v7  ;;  %v919_v31 = vld [vmem:[%s1387_s8] ss:$0 sm:$0xff] (!%p321_p9) }
  0x19   : > { %s362_s18 = scalar_select %p361_p10, %s1221_s17, 1  ;;  %988 = vmatprep.subr.bf16.mxu0 %v1139_v3 }
  0x1b   : > { %s912_s20 = sshll.u32 %s362_s18, 3  ;;  %s1143_s18 = smov [#allocation2]  }
  0x1c   : > { %s364_s26 = scalar_lea.vmem %s1393_s0, %s912_s20  ;;  %s1301_s20 = sand.u32 1, %s1129_s14  }
  0x1d   : > { %v365_v8 = vld [vmem:[%s364_s26] sm:$0xff]  ;;  %s911_s21 = sshll.u32 %s1301_s20, 3  ;;  %s925_s26 = sshll.u32 %s1221_s17, 7 }
  0x1e   : > { %953 = vmatmul.mubr.msk.f32.vlgmr.msra.gmra.mrb[0].mxu0 %vm377_vm1, %v365_v8  ;;  %s354_s25 = scalar_lea.vmem [#allocation2], %s911_s21  ;;  %s1311_s29 = scalar_lea.hbm %s1388_s9, %s925_s26 }
  0x1f   : > { %971 = vmatprep.mubr.msk.f32.mxu0 %vm1140_vm0, %v1141_v6  ;;  %990 = vmatpush3.bf16.msra.mxu0 %v989_v25  ;;  %s807_s30 = sshll.u32 %s354_s25, 4  ;;  %s790_s11 = scalar_lea.sflag [#allocation3], %s1301_s20  ;;  %s808_s30 = int_to_ptr.vmem [resolvable:$true] %s807_s30 }
  0x20   : > { %s1043_s12 = scalar_lea.vmem %s808_s30, 128  ;;  %s1047_s21 = sshll.u32 %s1143_s18, 4  ;;  %s1048_s21 = int_to_ptr.vmem [resolvable:$false] %s1047_s21 }
  0x21   : > { %p1044_p11 = scmp.ne.s32.totalorder %s808_s30, %s1043_s12  ;;  %s1049_s0 = scalar_lea.vmem %s1048_s21, 256 }
  0x22   : > { %p1050_p0 = scmp.lt.s32.totalorder %s808_s30, %s1048_s21  ;;  %p1051_p1 = scmp.lt.s32.totalorder %s1049_s0, %s1043_s12 }
  0x23   : > { %p1045_p12 = pnand %p1044_p11, %p1238_p5 }
  0x24   : > { %p1052_p2 = por %p1051_p1, %p1050_p0 }
  0x25   : > { %p1046_p13 = pneg %p1045_p12 }
  0x27   : > { %p1053_p3 = pnand %p1052_p2, %p1046_p13 }
  0xf1   : > { %v447_v13 = vpop.f32.mrb[0].mxu0 }
  0xf2   : > { %v448_v14 = vadd.f32 %v913_v12, %v447_v13  ;;  %v954_v15 = vpop.f32.mrb[1].mxu0 }
  0xf4   : > { %v451_v16 = vmax.f32 %v448_v14, 0.0 }
  0xf6   : > { %960 = vmatmul.mubr.msk.f32.vlgmr.msra.gmra.mrb[0].mxu1 %vm461_vm2, %v451_v16 }
  0xf7   : > { %964 = vmatprep.mubr.msk.f32.mxu1 %vm1140_vm0, %v1141_v6  ;;  %963 = vmatpush3.msra.mxu1 %v536_v17 }
  0xf8   : > { %974 = vmatprep.subr.mxu1 %v1141_v6 }
 0x1c9   : > { %v531_v19 = vpop.f32.mrb[0].mxu1 }
 0x1ca   : > { %v532_v20 = vadd.f32 %v915_v18, %v531_v19  ;;  %v961_v21 = vpop.f32.mrb[1].mxu1 }
 0x1cc   : > { %v535_v22 = vmax.f32 %v532_v20, 0.0 }
 0x1ce   : > { %965 = vmatmul.mubr.msk.f32.vlgmr.msra.gmra.mrb[2].mxu1 %vm544_vm3, %v535_v22 }
 0x1cf   : > { %976 = vmatprep.mubr.msk.f32.mxu1 %vm1140_vm0, %v1141_v6 }
 0x2a1   : > { %v614_v27 = vpop.f32.mrb[2].mxu1 }
 0x2a2   : > { %v615_v28 = vadd.f32 %v917_v26, %v614_v27  ;;  %v966_v29 = vpop.f32.mrb[3].mxu1 }
 0x2a4   : > { %v618_v30 = vmax.f32 %v615_v28, 0.0 }
 0x2a6   : > { %972 = vmatmul.mubr.msk.f32.vlgmr.msra.gmra.mrb[2].mxu0 %vm461_vm2, %v618_v30 }
 0x379   : > { %v697_v32 = vpop.f32.mrb[2].mxu0 }
 0x37a   : > { %v698_v33 = vadd.f32 %v919_v31, %v697_v32  ;;  %v973_v34 = vpop.f32.mrb[3].mxu0 }
 0x37c   : > { %v921_v35 = vmul.f32 -1.442695, %v698_v33 }
 0x37e   : > { %1039 = vpow2.f32 %v921_v35 }
 0x388   : > { %v1040_v36 = vpop.eup %1039 }
 0x389   : > { %v704_v37 = vadd.f32 1.0, %v1040_v36 }
 0x38b   : > { %1041 = vrcp.f32 %v704_v37 }
 0x395   : > { %v1042_v38 = vpop.eup %1041 }
 0x396   : > { %v708_v39 = vsub.f32 %v365_v8, %v1042_v38  ;;  %707 = vst.msk [vmem:[%s354_s25] sm:$0xff] %vm377_vm1, %v1042_v38 }
 0x398   : > { %v709_v40 = vmul.f32 %v708_v39, %v708_v39 }
 0x39a   : > { %975 = vmatpush3.xpose.msk.msra.mxu1 %vm377_vm1, %v709_v40 }
 0x39d   : > { %977 = vmatmul.mubr.msk.f32.vlgmr.msra.gmra.mrb[4].mxu1 %vm377_vm1, %v1142_v41 }
 0x39e   : > { %1056 = shalt.err (!%p1053_p3)
}
 0x39f   : > { %s1057_s25 = scalar_lea.hbm %s1311_s29, 128  ;;  %s1061_s28 = scalar_lea.hbm %s1388_s9, 256 }
 0x3a0   : > { %p1058_p4 = scmp.ne.s32.totalorder %s1311_s29, %s1057_s25  ;;  %p1062_p9 = scmp.lt.u32.totalorder %s1311_s29, %s1388_s9 }
 0x3a1   : > { %p1063_p10 = scmp.lt.u32.totalorder %s1061_s28, %s1057_s25  ;;  %p1065_p12 = scmp.lt.u32.totalorder %s1057_s25, %s1311_s29 }
 0x3a2   : > { %p1059_p7 = pnand %p1058_p4, %p1238_p5 }
 0x3a3   : > { %p1064_p11 = por %p1063_p10, %p1062_p9 }
 0x3a4   : > { %p1060_p8 = pneg %p1059_p7 }
 0x3a5   : > { %p1066_p13 = por %p1065_p12, %p1064_p11 }
 0x3a7   : > { %p1067_p0 = pnand %p1066_p13, %p1060_p8 }
 0x3a9   : > { %1070 = shalt.err (!%p1067_p0)
}
 0x3aa   : > { %991 = dma.vmem_to_hbm [thread:$0]  (%p1238_p5), %s808_s30, 128, %s1311_s29, %s790_s11   ;;  %vm787_vm4 = vcmask 57344  }
 0x3ab   : > { %s926_s0 = sshll.u32 %s1221_s17, 4  ;;  %s360_s12 = scalar_lea.vmem [#allocation4], %s1301_s20 }
 0x3ac   : > { %s820_s26 = sshll.u32 %s360_s12, 4  ;;  %s1336_s28 = scalar_lea.hbm %s1389_s10, %s926_s0  ;;  %s1338_s26 = int_to_ptr.vmem [resolvable:$true] %s820_s26 }
 0x3ad   : > { %s795_s18 = scalar_lea.sflag [#allocation5], %s1301_s20  ;;  %s1071_s29 = scalar_lea.vmem %s1338_s26, 16 }
 0x3ae   : > { %p1072_p1 = scmp.ne.s32.totalorder %s1338_s26, %s1071_s29  ;;  %s1144_s17 = smov [#allocation4]  }
 0x3af   : > { %s1075_s30 = sshll.u32 %s1144_s17, 4  ;;  %s1076_s30 = int_to_ptr.vmem [resolvable:$false] %s1075_s30 }
 0x3b0   : > { %p1073_p2 = pnand %p1072_p1, %p1238_p5  ;;  %s1077_s11 = scalar_lea.vmem %s1076_s30, 32 }
 0x3b1   : > { %p1078_p4 = scmp.lt.s32.totalorder %s1338_s26, %s1076_s30  ;;  %p1079_p7 = scmp.lt.s32.totalorder %s1077_s11, %s1071_s29 }
 0x3b2   : > { %p1074_p3 = pneg %p1073_p2 }
 0x3b3   : > { %p1080_p8 = por %p1079_p7, %p1078_p4 }
 0x3b5   : > { %p1081_p9 = pnand %p1080_p8, %p1074_p3 }
 0x470   : > { %v782_v42 = vpop.f32.mrb[4].mxu1 }
 0x471   : > { %v786_v43 = vmul.f32 0.03125, %v782_v42  ;;  %v978_v44 = vpop.f32.mrb[5].mxu1 }
 0x473   : > { %788 = vst.msk [vmem:[%s360_s12] sm:$0x1] %vm787_vm4, %v786_v43 }
 0x474   : > { %1084 = shalt.err (!%p1081_p9)
}
 0x475   : > { %s1085_s20 = scalar_lea.hbm %s1336_s28, 16  ;;  %s1089_s12 = scalar_lea.hbm %s1389_s10, 32 }
 0x476   : > { %p1086_p10 = scmp.ne.s32.totalorder %s1336_s28, %s1085_s20  ;;  %p1090_p13 = scmp.lt.u32.totalorder %s1336_s28, %s1389_s10 }
 0x477   : > { %p1091_p0 = scmp.lt.u32.totalorder %s1089_s12, %s1085_s20  ;;  %p1093_p2 = scmp.lt.u32.totalorder %s1085_s20, %s1336_s28 }
 0x478   : > { %p1087_p11 = pnand %p1086_p10, %p1238_p5 }
 0x479   : > { %p1092_p1 = por %p1091_p0, %p1090_p13 }
 0x47a   : > { %p1088_p12 = pneg %p1087_p11 }
 0x47b   : > { %p1094_p3 = por %p1093_p2, %p1092_p1 }
 0x47d   : > { %p1095_p4 = pnand %p1094_p3, %p1088_p12 }
 0x47f   : > { %1098 = shalt.err (!%p1095_p4)
}
 0x480   : > { %992 = dma.vmem_to_hbm [thread:$0]  (%p1238_p5), %s1338_s26, 16, %s1336_s28, %s795_s18  }
 0x481 PF: > { %p1002_p7 = scmp.ge.s32.totalorder %s1137_s16, 2  ;;  %s832_s29 = sand.u32 1, %s1125_s13  }
 0x482   : > { %s833_s17 = scalar_lea.sflag [#allocation3], %s832_s29 }
 0x483   : > { %p996_p8 = pnand %p1002_p7, %p1242_p6 }
 0x485   : > { %1116 = dma.done.wait (!%p996_p8), %s833_s17, 128  }
 0x486   : > { %1118 = vsyncadd (!%p996_p8), %s833_s17, 4294967168  ;;  %s842_s30 = scalar_lea.sflag [#allocation5], %s832_s29 }
 0x487   : > { %1120 = dma.done.wait (!%p996_p8), %s842_s30, 16  }
 0x488   : > { %1122 = vsyncadd (!%p996_p8), %s842_s30, 4294967280  ;;  %p24_p5 = scmp.ge.s32.totalorder %s1225_s19, 4   ;;  %s1394_s13 = smov %s1129_s14 }
 0x489   : > { %s1395_s14 = smov %s1133_s15  ;;  %s1396_s15 = smov %s1236_s22 }
 0x48a   : > { %s1397_s16 = smov %s1225_s19  ;;  %26 = sbr.rel (!%p24_p5) target bundleno = 7 (0x7), region = 108 }
 0x491   :  { %846 = vsyncpa [#allocation3], 1 }
 0x492   :  { %848 = vsyncpa [#allocation3 + $0x1], 1 }
 0x493   :  { %849 = vsyncpa [#allocation5], 1 }
 0x494   :  { %851 = vsyncpa [#allocation5 + $0x1], 1 }

</bundles_post_ra>
